<compile_context>
chip_gen: v6e
topology: v6e:2x2x1
jax: 0.10.0
libtpu: 0.0.40
codegen_flags: <defaults>
</compile_context>

<pallas_src>
import functools

import jax
import jax.numpy as jnp
from jax.experimental import pallas as pl
from jax.experimental.pallas import tpu as pltpu


def _round_up(v, m):
    return ((v + m - 1) // m) * m


def _pad2d(x, rows, cols):
    r, c = x.shape
    return jnp.pad(x, ((0, rows - r), (0, cols - c)))


def _pick_tile(n_pad, target):
    """Largest multiple of 128 <= target that divides n_pad (n_pad is a 128 multiple)."""
    t = max(128, (min(target, n_pad) // 128) * 128)
    while n_pad % t:
        t -= 128
    return t


def sage_layer_kernel(a_ref, hk_ref, hi_ref, ws_ref, wn_ref, b_ref, out_ref,
                      acc_ref, deg_ref, *, apply_relu):
    """One SAGEConv('mean') layer for one (row-tile i, reduction-tile k) grid point.

    a_ref   : (TM, TK) int8  adjacency tile (A[i, j] = 1 iff edge j -> i)
    hk_ref  : (TK, F)  bf16  node features entering the aggregation
    hi_ref  : (TM, F)  bf16  node features for the self term (this row tile)
    ws_ref  : (F, HP)  bf16  W_self   (resident across the grid)
    wn_ref  : (F, HP)  bf16  W_neigh  (resident across the grid)
    b_ref   : (1, HP)  f32   bias     (resident across the grid)
    out_ref : (TM, HP)       layer output for this row tile (dtype set by caller)
    acc_ref : (TM, F)  f32   VMEM scratch, neighbor feature-sum accumulator
    deg_ref : (TM, 1)  f32   VMEM scratch, in-degree accumulator
    """
    k = pl.program_id(1)

    @pl.when(k == 0)
    def _init():
        acc_ref[...] = jnp.zeros_like(acc_ref)
        deg_ref[...] = jnp.zeros_like(deg_ref)

    a_i8 = a_ref[...]
    # In-degree accumulation in-kernel (XLU lane reduce; free slack in a mem-bound loop).
    deg_ref[...] += jnp.sum(a_i8.astype(jnp.float32), axis=1, keepdims=True)
    # Neighbor feature sum: int8 adjacency upcast to bf16 right before the MXU dot.
    acc_ref[...] += jnp.dot(a_i8.astype(jnp.bfloat16), hk_ref[...],
                            preferred_element_type=jnp.float32)

    @pl.when(k == pl.num_programs(1) - 1)
    def _finalize():
        f = hi_ref.shape[1]
        # Mean aggregation in f32, once per row tile (exact 1/max(deg,1)).
        dinv = 1.0 / jnp.maximum(deg_ref[...], 1.0)
        neigh = (acc_ref[...] * dinv).astype(hi_ref.dtype)
        hi = hi_ref[...]
        if f % 128 == 0:
            # Single K=2F MXU pass (fills the 256-deep MXU on v6e/v7x when F=128).
            out = jnp.dot(jnp.concatenate([hi, neigh], axis=-1),
                          jnp.concatenate([ws_ref[...], wn_ref[...]], axis=0),
                          preferred_element_type=jnp.float32)
        else:
            # Small-F layer: lane concat would be sub-tile; keep two small-K dots.
            out = (jnp.dot(hi, ws_ref[...], preferred_element_type=jnp.float32)
                   + jnp.dot(neigh, wn_ref[...], preferred_element_type=jnp.float32))
        out = out + b_ref[...]
        if apply_relu:
            out = jnp.maximum(out, 0.0)
        out_ref[...] = out.astype(out_ref.dtype)


def _sage_conv_layer(adj_i8, h, ws, wn, b, *, out_dtype, apply_relu, tm, tk):
    """adj_i8: (N,N) int8 0/1, h: (N,F) bf16, ws/wn: (F,HP) bf16, b: (1,HP) f32.
       Returns (N, HP) `out_dtype`.  Requires N % tm == 0 and N % tk == 0."""
    n = adj_i8.shape[0]
    f = h.shape[1]
    hp = ws.shape[1]
    assert n % tm == 0 and n % tk == 0

    kernel = functools.partial(sage_layer_kernel, apply_relu=apply_relu)

    return pl.pallas_call(
        kernel,
        out_shape=jax.ShapeDtypeStruct((n, hp), out_dtype),
        grid_spec=pltpu.PrefetchScalarGridSpec(
            num_scalar_prefetch=0,
            grid=(n // tm, n // tk),
            in_specs=[
                pl.BlockSpec((tm, tk), lambda i, k: (i, k)),   # A tile (int8)
                pl.BlockSpec((tk, f), lambda i, k: (k, 0)),    # H rows being aggregated
                pl.BlockSpec((tm, f), lambda i, k: (i, 0)),    # H rows for self term
                pl.BlockSpec((f, hp), lambda i, k: (0, 0)),    # W_self  (resident)
                pl.BlockSpec((f, hp), lambda i, k: (0, 0)),    # W_neigh (resident)
                pl.BlockSpec((1, hp), lambda i, k: (0, 0)),    # bias    (resident)
            ],
            out_specs=pl.BlockSpec((tm, hp), lambda i, k: (i, 0)),
            scratch_shapes=[pltpu.VMEM((tm, f), jnp.float32),
                            pltpu.VMEM((tm, 1), jnp.float32)],
        ),
        compiler_params=pltpu.CompilerParams(
            dimension_semantics=("parallel", "arbitrary"),
            # v5e scoped default is 16 MiB; stay below v7x's 64 MiB/TC physical VMEM.
            vmem_limit_bytes=48 * 1024 * 1024,
        ),
    )(adj_i8, h, h, ws, wn, b)


def graphsage_forward(adj, x, params, *, tm=None, tk=None):
    """adj: (N, N) dense 0/1 adjacency (A[i,j]=1 iff edge j->i); int8 preferred
       (float inputs are cast; weighted adjacencies are not supported).
       x:   (N, in_feats) float32 node features.
       Returns (N, h_feats) float32."""
    n, in_feats = x.shape
    h_feats = params["w2_self"].shape[1]

    # Output dim lane-dense (128 multiple); small feature dims only sublane-aligned.
    f1 = _round_up(in_feats, 8)
    hp = _round_up(h_feats, 128)
    n_pad = _round_up(n, 128)

    # Tile choice: big tiles amortize per-step overhead; TM capped so the parallel row
    # axis has >= 2 steps (feeds both v7x TensorCores); both must divide n_pad.
    tm = _pick_tile(n_pad, tm if tm is not None else min(512, max(128, n_pad // 2)))
    tk = _pick_tile(n_pad, tk if tk is not None else 2048)

    # Adjacency as compact int8 (exact for 0/1 edges).
    adj_i8 = adj if adj.dtype == jnp.int8 else adj.astype(jnp.int8)
    adj_p = _pad2d(adj_i8, n_pad, n_pad)

    x_p = _pad2d(x, n_pad, f1).astype(jnp.bfloat16)

    w1s = _pad2d(params["w1_self"], f1, hp).astype(jnp.bfloat16)
    w1n = _pad2d(params["w1_neigh"], f1, hp).astype(jnp.bfloat16)
    b1 = _pad2d(params["b1"], 1, hp).astype(jnp.float32)
    w2s = _pad2d(params["w2_self"], hp, hp).astype(jnp.bfloat16)
    w2n = _pad2d(params["w2_neigh"], hp, hp).astype(jnp.bfloat16)
    b2 = _pad2d(params["b2"], 1, hp).astype(jnp.float32)

    # Layer 1 (ReLU fused into finalize, bf16 output feeds layer 2 directly), layer 2.
    h1 = _sage_conv_layer(adj_p, x_p, w1s, w1n, b1,
                          out_dtype=jnp.bfloat16, apply_relu=True, tm=tm, tk=tk)
    h2 = _sage_conv_layer(adj_p, h1, w2s, w2n, b2,
                          out_dtype=jnp.float32, apply_relu=False, tm=tm, tk=tk)

    return h2[:n, :h_feats]


def init_params(key, in_feats, h_feats):
    ks = jax.random.split(key, 4)
    scale1 = 1.0 / jnp.sqrt(in_feats)
    scale2 = 1.0 / jnp.sqrt(h_feats)
    return {
        "w1_self":  jax.random.normal(ks[0], (in_feats, h_feats), jnp.float32) * scale1,
        "w1_neigh": jax.random.normal(ks[1], (in_feats, h_feats), jnp.float32) * scale1,
        "b1":       jnp.zeros((1, h_feats), jnp.float32),
        "w2_self":  jax.random.normal(ks[2], (h_feats, h_feats), jnp.float32) * scale2,
        "w2_neigh": jax.random.normal(ks[3], (h_feats, h_feats), jnp.float32) * scale2,
        "b2":       jnp.zeros((1, h_feats), jnp.float32),
    }


def reference_forward(adj, x, params):
    """Pure-JAX f32 reference of the same math (for a sanity check)."""
    deg_inv = 1.0 / jnp.maximum(jnp.sum(adj, axis=1, keepdims=True), 1.0)
    neigh1 = (adj @ x) * deg_inv
    h1 = jnp.maximum(x @ params["w1_self"] + neigh1 @ params["w1_neigh"] + params["b1"], 0.0)
    neigh2 = (adj @ h1) * deg_inv
    return h1 @ params["w2_self"] + neigh2 @ params["w2_neigh"] + params["b2"]


if __name__ == "__main__":
    key = jax.random.PRNGKey(0)
    k_adj, k_x, k_p = jax.random.split(key, 3)

    # Small but tiling-exercising sizes: N=256 nodes.
    N, IN_FEATS, H_FEATS = 256, 8, 16

    # Deterministic random directed graph, dense int8 adjacency, no self loops.
    adj_bool = jax.random.uniform(k_adj, (N, N)) < 0.1
    adj_i8 = (adj_bool & ~jnp.eye(N, dtype=bool)).astype(jnp.int8)

    x = jax.random.normal(k_x, (N, IN_FEATS), jnp.float32)
    params = init_params(k_p, IN_FEATS, H_FEATS)
    ref = reference_forward(adj_i8.astype(jnp.float32), x, params)

    # 1) Adaptive default tiles (what a large graph would use, clamped to N).
    out = jax.block_until_ready(graphsage_forward(adj_i8, x, params))
    # 2) Small explicit tiles -> 2x2 grid, exercises multi-step k accumulation.
    out_small = jax.block_until_ready(graphsage_forward(adj_i8, x, params, tm=128, tk=128))

    for o in (out, out_small):
        assert o.shape == (N, H_FEATS)
        max_err = float(jnp.max(jnp.abs(o - ref)))
        # bf16 MXU operands / bf16 h1 vs f32 reference -> loosened tolerance.
        assert jnp.allclose(o, ref, atol=1e-1, rtol=5e-2), f"max abs err = {max_err}"

    print("KERNEL_OK")
</pallas_src>

<mosaic_0001>
module attributes {stable_mosaic.version = 11 : i64} {
  func.func @sage_layer_kernel(%arg0: i32, %arg1: i32, %arg2: memref<128x256xi8, #tpu.memory_space<vmem>>, %arg3: memref<256x8xbf16, #tpu.memory_space<vmem>>, %arg4: memref<128x8xbf16, #tpu.memory_space<vmem>>, %arg5: memref<8x128xbf16, #tpu.memory_space<vmem>>, %arg6: memref<8x128xbf16, #tpu.memory_space<vmem>>, %arg7: memref<1x128xf32, #tpu.memory_space<vmem>>, %arg8: memref<128x128xbf16, #tpu.memory_space<vmem>>, %arg9: memref<128x8xf32, #tpu.memory_space<vmem>>, %arg10: memref<128x1xf32, #tpu.memory_space<vmem>>) attributes {dimension_semantics = [#tpu.dimension_semantics<parallel>, #tpu.dimension_semantics<arbitrary>], iteration_bounds = array<i64: 2, 1>, scalar_prefetch = 0 : i64, scratch_operands = 2 : i64, tpu.core_type = #tpu.core_type<tc>, window_params = [{transform_indices = @transform_0, window_bounds = array<i64: 128, 256>}, {transform_indices = @transform_1, window_bounds = array<i64: 256, 8>}, {transform_indices = @transform_2, window_bounds = array<i64: 128, 8>}, {pipeline_mode = #tpu.pipeline_mode<synchronous>, transform_indices = @transform_3, window_bounds = array<i64: 8, 128>}, {pipeline_mode = #tpu.pipeline_mode<synchronous>, transform_indices = @transform_4, window_bounds = array<i64: 8, 128>}, {pipeline_mode = #tpu.pipeline_mode<synchronous>, transform_indices = @transform_5, window_bounds = array<i64: 1, 128>}, {transform_indices = @transform_6, window_bounds = array<i64: 128, 128>}]} {
    %c0_i32 = arith.constant 0 : i32
    %0 = arith.cmpi eq, %arg1, %c0_i32 : i32
    %1 = arith.extui %0 : i1 to i32
    %c0_i32_0 = arith.constant 0 : i32
    %2 = arith.cmpi ne, %1, %c0_i32_0 : i32
    scf.if %2 {
      %cst_15 = arith.constant 0.000000e+00 : f32
      %19 = vector.broadcast %cst_15 : f32 to vector<128x8xf32>
      %c0_16 = arith.constant 0 : index
      %c0_17 = arith.constant 0 : index
      %20 = vector.load %arg9[%c0_16, %c0_17] : memref<128x8xf32, #tpu.memory_space<vmem>>, vector<128x8xf32>
      tpu.vector_store %arg9[%c0_16, %c0_17], %19 {strides = array<i32>} : memref<128x8xf32, #tpu.memory_space<vmem>>, vector<128x8xf32>,
      %cst_18 = arith.constant 0.000000e+00 : f32
      %21 = vector.broadcast %cst_18 : f32 to vector<128x1xf32>
      %c0_19 = arith.constant 0 : index
      %c0_20 = arith.constant 0 : index
      %22 = vector.load %arg10[%c0_19, %c0_20] : memref<128x1xf32, #tpu.memory_space<vmem>>, vector<128x1xf32>
      tpu.vector_store %arg10[%c0_19, %c0_20], %21 {strides = array<i32>} : memref<128x1xf32, #tpu.memory_space<vmem>>, vector<128x1xf32>,
    } else {
    }
    %c0 = arith.constant 0 : index
    %c0_1 = arith.constant 0 : index
    %3 = vector.load %arg2[%c0, %c0_1] : memref<128x256xi8, #tpu.memory_space<vmem>>, vector<128x256xi8>
    %c0_2 = arith.constant 0 : index
    %c0_3 = arith.constant 0 : index
    %4 = vector.load %arg10[%c0_2, %c0_3] : memref<128x1xf32, #tpu.memory_space<vmem>>, vector<128x1xf32>
    %5 = arith.sitofp %3 : vector<128x256xi8> to vector<128x256xf32>
    %cst = arith.constant dense<0.000000e+00> : vector<128xf32>
    %6 = vector.multi_reduction <add>, %5, %cst [1] : vector<128x256xf32> to vector<128xf32>
    %7 = vector.shape_cast %6 : vector<128xf32> to vector<128x1xf32>
    %8 = arith.addf %4, %7 : vector<128x1xf32>
    %c0_4 = arith.constant 0 : index
    %c0_5 = arith.constant 0 : index
    %9 = vector.load %arg10[%c0_4, %c0_5] : memref<128x1xf32, #tpu.memory_space<vmem>>, vector<128x1xf32>
    tpu.vector_store %arg10[%c0_4, %c0_5], %8 {strides = array<i32>} : memref<128x1xf32, #tpu.memory_space<vmem>>, vector<128x1xf32>,
    %c0_6 = arith.constant 0 : index
    %c0_7 = arith.constant 0 : index
    %10 = vector.load %arg9[%c0_6, %c0_7] : memref<128x8xf32, #tpu.memory_space<vmem>>, vector<128x8xf32>
    %11 = arith.sitofp %3 : vector<128x256xi8> to vector<128x256xbf16>
    %c0_8 = arith.constant 0 : index
    %c0_9 = arith.constant 0 : index
    %12 = vector.load %arg3[%c0_8, %c0_9] : memref<256x8xbf16, #tpu.memory_space<vmem>>, vector<256x8xbf16>
    %cst_10 = arith.constant dense<0.000000e+00> : vector<128x8xf32>
    %13 = tpu.matmul %11, %12, %cst_10 {dimension_numbers = #tpu.dot_dimension_numbers<[1], [0], [0], [1], [0, 0, 1, 1], [], []>} : vector<128x256xbf16>, vector<256x8xbf16>, vector<128x8xf32> -> vector<128x8xf32>
    %14 = arith.addf %10, %13 : vector<128x8xf32>
    %c0_11 = arith.constant 0 : index
    %c0_12 = arith.constant 0 : index
    %15 = vector.load %arg9[%c0_11, %c0_12] : memref<128x8xf32, #tpu.memory_space<vmem>>, vector<128x8xf32>
    tpu.vector_store %arg9[%c0_11, %c0_12], %14 {strides = array<i32>} : memref<128x8xf32, #tpu.memory_space<vmem>>, vector<128x8xf32>,
    %c0_i32_13 = arith.constant 0 : i32
    %16 = arith.cmpi eq, %arg1, %c0_i32_13 : i32
    %17 = arith.extui %16 : i1 to i32
    %c0_i32_14 = arith.constant 0 : i32
    %18 = arith.cmpi ne, %17, %c0_i32_14 : i32
    scf.if %18 {
      %c0_15 = arith.constant 0 : index
      %c0_16 = arith.constant 0 : index
      %19 = vector.load %arg10[%c0_15, %c0_16] : memref<128x1xf32, #tpu.memory_space<vmem>>, vector<128x1xf32>
      %cst_17 = arith.constant 1.000000e+00 : f32
      %20 = vector.broadcast %cst_17 : f32 to vector<128x1xf32>
      %21 = arith.maximumf %19, %20 : vector<128x1xf32>
      %cst_18 = arith.constant 1.000000e+00 : f32
      %22 = vector.broadcast %cst_18 : f32 to vector<128x1xf32>
      %23 = arith.divf %22, %21 : vector<128x1xf32>
      %c0_19 = arith.constant 0 : index
      %c0_20 = arith.constant 0 : index
      %24 = vector.load %arg9[%c0_19, %c0_20] : memref<128x8xf32, #tpu.memory_space<vmem>>, vector<128x8xf32>
      %25 = vector.broadcast %23 : vector<128x1xf32> to vector<128x8xf32>
      %26 = arith.mulf %24, %25 : vector<128x8xf32>
      %27 = arith.truncf %26 : vector<128x8xf32> to vector<128x8xbf16>
      %c0_21 = arith.constant 0 : index
      %c0_22 = arith.constant 0 : index
      %28 = vector.load %arg4[%c0_21, %c0_22] : memref<128x8xbf16, #tpu.memory_space<vmem>>, vector<128x8xbf16>
      %c0_23 = arith.constant 0 : index
      %c0_24 = arith.constant 0 : index
      %29 = vector.load %arg5[%c0_23, %c0_24] : memref<8x128xbf16, #tpu.memory_space<vmem>>, vector<8x128xbf16>
      %cst_25 = arith.constant dense<0.000000e+00> : vector<128x128xf32>
      %30 = tpu.matmul %28, %29, %cst_25 {dimension_numbers = #tpu.dot_dimension_numbers<[1], [0], [0], [1], [0, 0, 1, 1], [], []>} : vector<128x8xbf16>, vector<8x128xbf16>, vector<128x128xf32> -> vector<128x128xf32>
      %c0_26 = arith.constant 0 : index
      %c0_27 = arith.constant 0 : index
      %31 = vector.load %arg6[%c0_26, %c0_27] : memref<8x128xbf16, #tpu.memory_space<vmem>>, vector<8x128xbf16>
      %cst_28 = arith.constant dense<0.000000e+00> : vector<128x128xf32>
      %32 = tpu.matmul %27, %31, %cst_28 {dimension_numbers = #tpu.dot_dimension_numbers<[1], [0], [0], [1], [0, 0, 1, 1], [], []>} : vector<128x8xbf16>, vector<8x128xbf16>, vector<128x128xf32> -> vector<128x128xf32>
      %33 = arith.addf %30, %32 : vector<128x128xf32>
      %c0_29 = arith.constant 0 : index
      %c0_30 = arith.constant 0 : index
      %34 = vector.load %arg7[%c0_29, %c0_30] : memref<1x128xf32, #tpu.memory_space<vmem>>, vector<1x128xf32>
      %35 = vector.broadcast %34 : vector<1x128xf32> to vector<128x128xf32>
      %36 = arith.addf %33, %35 : vector<128x128xf32>
      %cst_31 = arith.constant 0.000000e+00 : f32
      %37 = vector.broadcast %cst_31 : f32 to vector<128x128xf32>
      %38 = arith.maximumf %36, %37 : vector<128x128xf32>
      %39 = arith.truncf %38 : vector<128x128xf32> to vector<128x128xbf16>
      %c0_32 = arith.constant 0 : index
      %c0_33 = arith.constant 0 : index
      %40 = vector.load %arg8[%c0_32, %c0_33] : memref<128x128xbf16, #tpu.memory_space<vmem>>, vector<128x128xbf16>
      tpu.vector_store %arg8[%c0_32, %c0_33], %39 {strides = array<i32>} : memref<128x128xbf16, #tpu.memory_space<vmem>>, vector<128x128xbf16>,
    } else {
    }
    return
  }
  func.func @transform_0(%arg0: i32, %arg1: i32) -> (i32, i32) {
    %c0_i32 = arith.constant 0 : i32
    return %arg0, %arg1 : i32, i32
  }
  func.func @transform_1(%arg0: i32, %arg1: i32) -> (i32, i32) {
    %c0_i32 = arith.constant 0 : i32
    %c0_i32_0 = arith.constant 0 : i32
    return %arg1, %c0_i32 : i32, i32
  }
  func.func @transform_2(%arg0: i32, %arg1: i32) -> (i32, i32) {
    %c0_i32 = arith.constant 0 : i32
    %c0_i32_0 = arith.constant 0 : i32
    return %arg0, %c0_i32 : i32, i32
  }
  func.func @transform_3(%arg0: i32, %arg1: i32) -> (i32, i32) {
    %c0_i32 = arith.constant 0 : i32
    %c0_i32_0 = arith.constant 0 : i32
    %c0_i32_1 = arith.constant 0 : i32
    return %c0_i32, %c0_i32_0 : i32, i32
  }
  func.func @transform_4(%arg0: i32, %arg1: i32) -> (i32, i32) {
    %c0_i32 = arith.constant 0 : i32
    %c0_i32_0 = arith.constant 0 : i32
    %c0_i32_1 = arith.constant 0 : i32
    return %c0_i32, %c0_i32_0 : i32, i32
  }
  func.func @transform_5(%arg0: i32, %arg1: i32) -> (i32, i32) {
    %c0_i32 = arith.constant 0 : i32
    %c0_i32_0 = arith.constant 0 : i32
    %c0_i32_1 = arith.constant 0 : i32
    return %c0_i32, %c0_i32_0 : i32, i32
  }
  func.func @transform_6(%arg0: i32, %arg1: i32) -> (i32, i32) {
    %c0_i32 = arith.constant 0 : i32
    %c0_i32_0 = arith.constant 0 : i32
    return %arg0, %c0_i32 : i32, i32
  }
}

</mosaic_0001>

<bundles_post_ra>
// kernel: tpu_custom_call.1
= control target key start
LH: loop header
LB: loop body
LE: loop exit
PB: predicated region body
PF: predicated region fallthrough
CT: control target
= control target key end

     0   :  { %11 = vsyncpa [#allocation5], 0  ;;  %s2472_s0 = inlined_call_operand.vmem [shape: s8[256,256], index: 0, kind: input, shape index: {}]   ;;  %s2473_s1 = inlined_call_operand.vmem [shape: bf16[256,8], index: 1, kind: input, shape index: {}]   ;;  %s2474_s2 = inlined_call_operand.vmem [shape: bf16[256,8], index: 2, kind: input, shape index: {}]   ;;  %s2475_s3 = inlined_call_operand.vmem [shape: bf16[8,128], index: 3, kind: input, shape index: {}]   ;;  %s2476_s4 = inlined_call_operand.vmem [shape: bf16[8,128], index: 4, kind: input, shape index: {}]   ;;  %s2477_s5 = inlined_call_operand.vmem [shape: f32[1,128], index: 5, kind: input, shape index: {}]   ;;  %s2478_s6 = inlined_call_operand.hbm [shape: bf16[256,128], index: 6, kind: output, shape index: {}]  }
   0x1   :  { %13 = vsyncpa [#allocation5 + $0x1], 0  ;;  %s2050_s21 = smov 0   ;;  %s2052_s22 = smov 0  }
   0x2   :  { %s2054_s23 = smov 0   ;;  %s2056_s24 = smov 0  }
   0x3   :  { %s2058_s25 = smov 0   ;;  %s2060_s26 = smov 0  }
   0x4 LB: > { %s1556_s27 = sadd.s32 4294967295, %s2008_s26   ;;  %s1557_s28 = sadd.s32 4294967294, %s2008_s26   ;;  %s2008_s26 = sphi %s2060_s26, %s19_s26   ;;  %s2004_s25 = sphi %s2058_s25, %s2485_s25   ;;  %s2000_s24 = sphi %s2056_s24, %s2484_s24   ;;  %s1996_s23 = sphi %s2054_s23, %s2483_s23   ;;  %s1992_s22 = sphi %s2052_s22, %s2482_s22   ;;  %s1988_s21 = sphi %s2050_s21, %s2481_s21  }
   0x5   : > { %s31_s29 = sadd.s32 1, %s2004_s25  ;;  %s181_s30 = sadd.s32 1, %s1996_s23 }
   0x6   : > { %p33_p0 = scmp.ge.s32.totalorder %s31_s29, 2  ;;  %p191_p1 = scmp.ne.s32.totalorder %s1996_s23, %s1992_s22 }
   0x7   : > { %p192_p2 = scmp.eq.s32.totalorder %s1556_s27, 1  ;;  %p197_p3 = scmp.ne.s32.totalorder %s1992_s22, %s1988_s21 }
   0x8   : > { %s2487_s29 = smov (%p33_p0, %s31_s29), 0  ;;  %p198_p5 = scmp.eq.s32.totalorder %s1557_s28, 1 }
   0x9   : > { %p2090_p4 = por %p192_p2, %p191_p1  ;;  %s178_s8 = ssub.s32 %s2004_s25, %s2487_s29 }
   0xa   : > { %p1561_p6 = scmp.ge.s32.totalorder %s2008_s26, 1  ;;  %p179_p7 = scmp.eq.s32.totalorder %s178_s8, 0 }
   0xb   : > { %p2097_p8 = por %p198_p5, %p197_p3  ;;  %p258_p9 = scmp.lt.s32.totalorder %s2008_s26, 3 }
   0xc   : > { %s2103_s10 = scalar_select %p179_p7, %s1996_s23, %s181_s30  }
   0xd   : > { %p259_p10 = pnand %p1561_p6, %p258_p9 }
   0xe   : > { %s1563_s11 = sshll.u32 (!%p259_p10), %s2000_s24, 2  ;;  %s1566_s8 = sshll.u32 (!%p259_p10), %s2000_s24, 4 }
   0xf   : > { %262 = sbr.rel (%p259_p10) target bundleno = 620 (0x26c), region = 44  ;;  %p305_p11 = scmp.lt.s32.totalorder (!%p259_p10), %s1563_s11, 7 }
  0x10   : > { %p322_p12 = scmp.lt.s32.totalorder (!%p259_p10), %s1566_s8, 31  ;;  %s300_s17 = sand.u32 (!%p259_p10), 1, %s1992_s22  }
  0x11   : > { %s1562_s18 = sshll.u32 (!%p259_p10), %s300_s17, 6  ;;  %s1647_s20 = sshll.u32 (!%p259_p10), %s2000_s24, 10 }
  0x12   : > { %s2390_s19 = scalar_lea.vmem (!%p259_p10), [#allocation4], %s1562_s18  ;;  %s2012_s13 = smov (!%p259_p10), [#allocation4]  }
  0x13   : > { %s1453_s27 = sshll.u32 (!%p259_p10), %s2390_s19, 4  ;;  %s1936_s14 = sshll.u32 (!%p259_p10), %s2012_s13, 4  ;;  %s2421_s27 = int_to_ptr.vmem [resolvable:$true] %s1453_s27  ;;  %s1937_s14 = int_to_ptr.vmem [resolvable:$false] %s1936_s14 }
  0x14   : > { %v1876_v0 = vld [vmem:[%s2473_s1 + $0x78] sm:$0xff]   ;;  %v1878_v2 = vld [vmem:[%s2473_s1 + $0x70] sm:$0xff]   ;;  %s2489_s11 = smov (!%p305_p11, %s1563_s11), 7  ;;  %v1880_v4 = vld [vmem:[%s2473_s1 + $0x68] sm:$0xff]   ;;  %vm350_vm0 = vcmask 7168   ;;  %v2010_v5 = vmov 0.0   ;;  %p1939_p2 = scmp.lt.s32.totalorder %s2421_s27, %s1937_s14 }
  0x15   : > { %v1877_v1 = vld [vmem:[%s2473_s1 + $0x38] sm:$0xff]   ;;  %1695 = vmatprep.subr.bf16.mxu0 %v1876_v0  ;;  %v1879_v3 = vld [vmem:[%s2473_s1 + $0x30] sm:$0xff]   ;;  %s1630_s28 = sshll.u32 %s2489_s11, 4  ;;  %353 = vst.msk [vmem:[#allocation3 + $0x10] sm:$0xff] %vm350_vm0, %v2010_v5  ;;  %351 = vst.msk [vmem:[#allocation3] sm:$0xff] %vm350_vm0, %v2010_v5  ;;  %vm333_vm1 = vcmask 64512  }
  0x16   : > { %1696 = vmatpush3.bf16.msra.mxu0 %v1877_v1  ;;  %352 = vst.msk [vmem:[#allocation3 + $0x8] sm:$0xff] %vm350_vm0, %v2010_v5  ;;  %354 = vst.msk [vmem:[#allocation3 + $0x18] sm:$0xff] %vm350_vm0, %v2010_v5  ;;  %s2156_s11 = scalar_lea.vmem %s2472_s0, %s1630_s28  ;;  %v1881_v8 = vld [vmem:[%s2473_s1 + $0x28] sm:$0xff]   ;;  %v1882_v13 = vld [vmem:[%s2473_s1 + $0x60] sm:$0xff]   ;;  %vm1055_vm2 = vcmask 1043456   ;;  %s2491_s8 = smov (!%p322_p12, %s1566_s8), 31 }
  0x17   : > { %1697 = vmatprep.subr.bf16.mxu0 %v1878_v2  ;;  %355 = vst.msk [vmem:[#allocation3 + $0x20] sm:$0xff] %vm350_vm0, %v2010_v5  ;;  %356 = vst.msk [vmem:[#allocation3 + $0x28] sm:$0xff] %vm350_vm0, %v2010_v5  ;;  %v2159_v6 = vld [vmem:[%s2156_s11] sm:$0xff]  ;;  %v2162_v7 = vld [vmem:[%s2156_s11 + $0x8] sm:$0xff]  ;;  %s1567_s12 = sshll.u32 %s2491_s8, 2  ;;  %s2419_s8 = scalar_lea.hbm %s2478_s6, %s1647_s20 }
  0x18   : > { %357 = vst.msk [vmem:[#allocation3 + $0x30] sm:$0xff] %vm350_vm0, %v2010_v5  ;;  %358 = vst.msk [vmem:[#allocation3 + $0x38] sm:$0xff] %vm350_vm0, %v2010_v5  ;;  %v395_v9 = vunpack.c.2.s8 %v2159_v6  ;;  %v396_v10 = vunpack.c.2.s8 %v2162_v7  ;;  %v391_v11 = vunpack.c.0.s8 %v2159_v6  ;;  %v392_v12 = vunpack.c.0.s8 %v2162_v7  ;;  %v2179_v18 = vld [vmem:[%s2156_s11 + $0x10] sm:$0xff]  ;;  %v2182_v19 = vld [vmem:[%s2156_s11 + $0x18] sm:$0xff]  ;;  %s2327_s15 = scalar_lea.vmem %s2474_s2, %s1567_s12  ;;  %s2427_s12 = scalar_lea.sflag [#allocation5], %s300_s17 }
  0x19   : > { %359 = vst.msk [vmem:[#allocation3 + $0x40] sm:$0xff] %vm350_vm0, %v2010_v5  ;;  %360 = vst.msk [vmem:[#allocation3 + $0x48] sm:$0xff] %vm350_vm0, %v2010_v5  ;;  %v397_v14 = vunpack.c.3.s8 %v2159_v6  ;;  %v398_v15 = vunpack.c.3.s8 %v2162_v7  ;;  %v393_v16 = vunpack.c.1.s8 %v2159_v6  ;;  %v394_v17 = vunpack.c.1.s8 %v2162_v7  ;;  %v2185_v28 = vld [vmem:[%s2156_s11 + $0x20] sm:$0xff]  ;;  %v1884_v34 = vld [vmem:[%s2473_s1 + $0x58] sm:$0xff]   ;;  %s1932_s24 = scalar_lea.vmem %s2421_s27, 1024 }
  0x1a   : > { %361 = vst.msk [vmem:[#allocation3 + $0x50] sm:$0xff] %vm350_vm0, %v2010_v5  ;;  %362 = vst.msk [vmem:[#allocation3 + $0x58] sm:$0xff] %vm350_vm0, %v2010_v5  ;;  %1698 = vmatpush3.bf16.msra.mxu0 %v1879_v3  ;;  %v427_v20 = vcvt.s32.f32 %v395_v9  ;;  %v428_v21 = vcvt.s32.f32 %v396_v10  ;;  %v423_v22 = vcvt.s32.f32 %v391_v11  ;;  %v424_v23 = vcvt.s32.f32 %v392_v12  ;;  %v1883_v29 = vld [vmem:[%s2473_s1 + $0x20] sm:$0xff]   ;;  %v2196_v37 = vld [vmem:[%s2156_s11 + $0x28] sm:$0xff]  ;;  %p1933_p13 = scmp.ne.s32.totalorder %s2421_s27, %s1932_s24 }
  0x1b   : > { %363 = vst.msk [vmem:[#allocation3 + $0x60] sm:$0xff] %vm350_vm0, %v2010_v5  ;;  %364 = vst.msk [vmem:[#allocation3 + $0x68] sm:$0xff] %vm350_vm0, %v2010_v5  ;;  %1699 = vmatprep.subr.bf16.mxu0 %v1880_v4  ;;  %v429_v24 = vcvt.s32.f32 %v397_v14  ;;  %v430_v25 = vcvt.s32.f32 %v398_v15  ;;  %v425_v26 = vcvt.s32.f32 %v393_v16  ;;  %v426_v27 = vcvt.s32.f32 %v394_v17  ;;  %v1885_v44 = vld [vmem:[%s2473_s1 + $0x18] sm:$0xff]   ;;  %v1886_v47 = vld [vmem:[%s2473_s1 + $0x50] sm:$0xff]  }
  0x1c   : > { %365 = vst.msk [vmem:[#allocation3 + $0x70] sm:$0xff] %vm350_vm0, %v2010_v5  ;;  %366 = vst.msk [vmem:[#allocation3 + $0x78] sm:$0xff] %vm350_vm0, %v2010_v5  ;;  %v461_v30 = vadd.f32 %v428_v21, %v427_v20  ;;  %v455_v31 = vadd.f32 %v424_v23, %v423_v22  ;;  %v401_v32 = vunpack.c.1.s8 %v2179_v18  ;;  %v402_v33 = vunpack.c.1.s8 %v2182_v19  ;;  %v1887_v56 = vld [vmem:[%s2473_s1 + $0x10] sm:$0xff]   ;;  %v1888_v60 = vld [vmem:[%s2473_s1 + $0x48] sm:$0xff]   ;;  %p1934_p0 = pnand %p1933_p13, %p2090_p4 }
  0x1d   : > { %v464_v35 = vadd.f32 %v430_v25, %v429_v24  ;;  %v458_v36 = vadd.f32 %v426_v27, %v425_v26  ;;  %v405_v40 = vunpack.c.3.s8 %v2179_v18  ;;  %v406_v41 = vunpack.c.3.s8 %v2182_v19  ;;  %v2221_v62 = vld [vmem:[%s2156_s11 + $0x30] sm:$0xff]  ;;  %v2224_v63 = vld [vmem:[%s2156_s11 + $0x38] sm:$0xff]  ;;  %v1889_v12 = vld [vmem:[%s2473_s1 + $0x8] sm:$0xff]   ;;  %334 = vst.msk [vmem:[#allocation2] sm:$0xff] %vm333_vm1, %v2010_v5 }
  0x1e   : > { %1700 = vmatpush3.bf16.msra.mxu0 %v1881_v8  ;;  %462 = vadd.xlane.f32.xlu1 %v461_v30  ;;  %v433_v38 = vcvt.s32.f32 %v401_v32  ;;  %v434_v39 = vcvt.s32.f32 %v402_v33  ;;  %v399_v42 = vunpack.c.0.s8 %v2179_v18  ;;  %v400_v43 = vunpack.c.0.s8 %v2182_v19  ;;  %v1890_v17 = vld [vmem:[%s2473_s1 + $0x40] sm:$0xff]   ;;  %335 = vst.msk [vmem:[#allocation2 + $0x8] sm:$0xff] %vm333_vm1, %v2010_v5  ;;  %336 = vst.msk [vmem:[#allocation2 + $0x10] sm:$0xff] %vm333_vm1, %v2010_v5  ;;  %p1935_p1 = pneg %p1934_p0 }
  0x1f   : > { %1701 = vmatprep.subr.bf16.mxu0 %v1882_v13  ;;  %456 = vadd.xlane.f32.xlu0 %v455_v31  ;;  %v409_v45 = vunpack.c.1.s8 %v2185_v28  ;;  %v410_v46 = vunpack.c.1.s8 %v2196_v37  ;;  %v437_v51 = vcvt.s32.f32 %v405_v40  ;;  %v438_v52 = vcvt.s32.f32 %v406_v41  ;;  %337 = vst.msk [vmem:[#allocation2 + $0x18] sm:$0xff] %vm333_vm1, %v2010_v5  ;;  %338 = vst.msk [vmem:[#allocation2 + $0x20] sm:$0xff] %vm333_vm1, %v2010_v5 }
  0x20   : > { %v431_v48 = vcvt.s32.f32 %v399_v42  ;;  %v432_v49 = vcvt.s32.f32 %v400_v43  ;;  %v470_v50 = vadd.f32 %v434_v39, %v433_v38  ;;  %v403_v54 = vunpack.c.2.s8 %v2179_v18  ;;  %339 = vst.msk [vmem:[#allocation2 + $0x28] sm:$0xff] %vm333_vm1, %v2010_v5  ;;  %340 = vst.msk [vmem:[#allocation2 + $0x30] sm:$0xff] %vm333_vm1, %v2010_v5 }
  0x21   : > { %v404_v55 = vunpack.c.2.s8 %v2182_v19  ;;  %v441_v57 = vcvt.s32.f32 %v409_v45  ;;  %v442_v58 = vcvt.s32.f32 %v410_v46  ;;  %v413_v59 = vunpack.c.3.s8 %v2185_v28  ;;  %341 = vst.msk [vmem:[#allocation2 + $0x38] sm:$0xff] %vm333_vm1, %v2010_v5  ;;  %342 = vst.msk [vmem:[#allocation2 + $0x40] sm:$0xff] %vm333_vm1, %v2010_v5 }
  0x22   : > { %1702 = vmatpush3.bf16.msra.mxu0 %v1883_v29  ;;  %465 = vadd.xlane.f32.xlu1 %v464_v35  ;;  %v467_v53 = vadd.f32 %v432_v49, %v431_v48  ;;  %v414_v61 = vunpack.c.3.s8 %v2196_v37  ;;  %v435_v0 = vcvt.s32.f32 %v403_v54  ;;  %v407_v2 = vunpack.c.0.s8 %v2185_v28  ;;  %v1891_v29 = vld [vmem:[%s2473_s1] sm:$0xff]   ;;  %343 = vst.msk [vmem:[#allocation2 + $0x48] sm:$0xff] %vm333_vm1, %v2010_v5  ;;  %344 = vst.msk [vmem:[#allocation2 + $0x50] sm:$0xff] %vm333_vm1, %v2010_v5 }
  0x23   : > { %1703 = vmatprep.subr.bf16.mxu0 %v1884_v34  ;;  %459 = vadd.xlane.f32.xlu0 %v458_v36  ;;  %v436_v1 = vcvt.s32.f32 %v404_v55  ;;  %v476_v3 = vadd.f32 %v438_v52, %v437_v51  ;;  %v408_v4 = vunpack.c.0.s8 %v2196_v37  ;;  %v411_v10 = vunpack.c.2.s8 %v2185_v28  ;;  %345 = vst.msk [vmem:[#allocation2 + $0x58] sm:$0xff] %vm333_vm1, %v2010_v5  ;;  %346 = vst.msk [vmem:[#allocation2 + $0x60] sm:$0xff] %vm333_vm1, %v2010_v5 }
  0x24   : > { %v439_v9 = vcvt.s32.f32 %v407_v2  ;;  %v412_v11 = vunpack.c.2.s8 %v2196_v37  ;;  %v482_v13 = vadd.f32 %v442_v58, %v441_v57  ;;  %v417_v14 = vunpack.c.1.s8 %v2221_v62  ;;  %347 = vst.msk [vmem:[#allocation2 + $0x68] sm:$0xff] %vm333_vm1, %v2010_v5  ;;  %348 = vst.msk [vmem:[#allocation2 + $0x70] sm:$0xff] %vm333_vm1, %v2010_v5  ;;  %v376_v2 = vld [vmem:[#allocation3 + $0x8] sm:$0xff] }
  0x25   : > { %v473_v8 = vadd.f32 %v436_v1, %v435_v0  ;;  %v418_v15 = vunpack.c.1.s8 %v2224_v63  ;;  %v440_v16 = vcvt.s32.f32 %v408_v4  ;;  %v445_v20 = vcvt.s32.f32 %v413_v59  ;;  %349 = vst.msk [vmem:[#allocation2 + $0x78] sm:$0xff] %vm333_vm1, %v2010_v5  ;;  %v378_v1 = vld [vmem:[#allocation3 + $0x18] sm:$0xff] }
  0x26   : > { %1704 = vmatpush3.bf16.msra.mxu0 %v1885_v44  ;;  %471 = vadd.xlane.f32.xlu1 %v470_v50  ;;  %v446_v21 = vcvt.s32.f32 %v414_v61  ;;  %v415_v22 = vunpack.c.0.s8 %v2221_v62  ;;  %v416_v23 = vunpack.c.0.s8 %v2224_v63  ;;  %v443_v25 = vcvt.s32.f32 %v411_v10  ;;  %v380_v10 = vld [vmem:[#allocation3 + $0x28] sm:$0xff] }
  0x27   : > { %1705 = vmatprep.subr.bf16.mxu0 %v1886_v47  ;;  %468 = vadd.xlane.f32.xlu0 %v467_v53  ;;  %v479_v24 = vadd.f32 %v440_v16, %v439_v9  ;;  %v444_v26 = vcvt.s32.f32 %v412_v11  ;;  %v553_v27 = vunpack.c.l.s8.bf16 %v2162_v7  ;;  %v449_v30 = vcvt.s32.f32 %v417_v14  ;;  %v379_v11 = vld [vmem:[#allocation3 + $0x20] sm:$0xff]  ;;  %v381_v16 = vld [vmem:[#allocation3 + $0x30] sm:$0xff] }
  0x28   : > { %v450_v31 = vcvt.s32.f32 %v418_v15  ;;  %v488_v32 = vadd.f32 %v446_v21, %v445_v20  ;;  %v421_v33 = vunpack.c.3.s8 %v2221_v62  ;;  %v422_v34 = vunpack.c.3.s8 %v2224_v63  ;;  %v382_v15 = vld [vmem:[#allocation3 + $0x38] sm:$0xff] }
  0x29   : > { %728 = vmatprep.mubr.bf16.mxu0 %v553_v27  ;;  %v419_v35 = vunpack.c.2.s8 %v2221_v62  ;;  %v485_v36 = vadd.f32 %v444_v26, %v443_v25  ;;  %v447_v38 = vcvt.s32.f32 %v415_v22  ;;  %v448_v39 = vcvt.s32.f32 %v416_v23  ;;  %v384_v26 = vld [vmem:[#allocation3 + $0x48] sm:$0xff] }
  0x2a   : > { %1706 = vmatpush3.bf16.msra.mxu0 %v1887_v56  ;;  %477 = vadd.xlane.f32.xlu1 %v476_v3  ;;  %v420_v40 = vunpack.c.2.s8 %v2224_v63  ;;  %v552_v41 = vunpack.c.l.s8.bf16 %v2159_v6  ;;  %v555_v42 = vunpack.c.h.s8.bf16 %v2162_v7  ;;  %v494_v43 = vadd.f32 %v450_v31, %v449_v30 }
  0x2b   : > { %1707 = vmatprep.subr.bf16.mxu0 %v1888_v60  ;;  %474 = vadd.xlane.f32.xlu0 %v473_v8  ;;  %v453_v44 = vcvt.s32.f32 %v421_v33  ;;  %v454_v45 = vcvt.s32.f32 %v422_v34  ;;  %v491_v46 = vadd.f32 %v448_v39, %v447_v38  ;;  %v451_v47 = vcvt.s32.f32 %v419_v35  ;;  %v386_v38 = vld [vmem:[#allocation3 + $0x58] sm:$0xff]  ;;  %v385_v39 = vld [vmem:[#allocation3 + $0x50] sm:$0xff] }
  0x2c   : > { %v452_v48 = vcvt.s32.f32 %v420_v40  ;;  %v554_v51 = vunpack.c.h.s8.bf16 %v2159_v6  ;;  %v557_v52 = vunpack.c.l.s8.bf16 %v2182_v19  ;;  %v556_v7 = vunpack.c.l.s8.bf16 %v2179_v18 }
  0x2d   : > { %v500_v49 = vadd.f32 %v454_v45, %v453_v44  ;;  %v559_v53 = vunpack.c.h.s8.bf16 %v2182_v19  ;;  %v2011_v54 = vmov 0   ;;  %v558_v55 = vunpack.c.h.s8.bf16 %v2179_v18 }
  0x2e   : > { %1708 = vmatpush3.bf16.msra.mxu0 %v1889_v12  ;;  %483 = vadd.xlane.f32.xlu1 %v482_v13  ;;  %v497_v50 = vadd.f32 %v452_v48, %v451_v47  ;;  %v561_v56 = vunpack.c.l.s8.bf16 %v2196_v37  ;;  %v560_v6 = vunpack.c.l.s8.bf16 %v2185_v28  ;;  %v563_v57 = vunpack.c.h.s8.bf16 %v2196_v37  ;;  %v375_v37 = vld [vmem:[#allocation3] sm:$0xff] }
  0x2f   : > { %1709 = vmatprep.subr.bf16.mxu0 %v1890_v17  ;;  %480 = vadd.xlane.f32.xlu0 %v479_v24  ;;  %v562_v58 = vunpack.c.h.s8.bf16 %v2185_v28  ;;  %v565_v19 = vunpack.c.l.s8.bf16 %v2224_v63  ;;  %v564_v59 = vunpack.c.l.s8.bf16 %v2221_v62  ;;  %v567_v18 = vunpack.c.h.s8.bf16 %v2224_v63  ;;  %v377_v28 = vld [vmem:[#allocation3 + $0x10] sm:$0xff]  ;;  %v387_v47 = vld [vmem:[#allocation3 + $0x60] sm:$0xff] }
  0x30   : > { %1874 = vset.pattern.permute.xlu0 %v2011_v54  ;;  %1875 = vset.pattern.permute.xlu1 %v2011_v54  ;;  %v566_v60 = vunpack.c.h.s8.bf16 %v2221_v62  ;;  %v390_v54 = vld [vmem:[#allocation3 + $0x78] sm:$0xff] }
  0x32   : > { %1710 = vmatpush3.bf16.msra.mxu0 %v1891_v29  ;;  %489 = vadd.xlane.f32.xlu1 %v488_v32  ;;  %v383_v29 = vld [vmem:[#allocation3 + $0x40] sm:$0xff] }
  0x33   : > { %486 = vadd.xlane.f32.xlu0 %v485_v36 }
  0x35   : > { %729 = vmatmul.mubr.bf16.vlgmr.msra.gmra.mxu0 %v552_v41 }
  0x36   : > { %736 = vmatprep.mubr.bf16.mxu0 %v555_v42  ;;  %495 = vadd.xlane.f32.xlu1 %v494_v43 }
  0x37   : > { %492 = vadd.xlane.f32.xlu0 %v491_v46  ;;  %v388_v46 = vld [vmem:[#allocation3 + $0x68] sm:$0xff] }
  0x3a   : > { %501 = vadd.xlane.f32.xlu1 %v500_v49 }
  0x3b   : > { %498 = vadd.xlane.f32.xlu0 %v497_v50 }
  0x3d   : > { %737 = vmatmul.mubr.bf16.gmra.mxu0 %v554_v51 }
  0x3e   : > { %744 = vmatprep.mubr.bf16.mxu0 %v557_v52 }
  0x45   : > { %745 = vmatmul.mubr.bf16.gmra.mxu0 %v556_v7 }
  0x46   : > { %752 = vmatprep.mubr.bf16.mxu0 %v559_v53 }
  0x4d   : > { %753 = vmatmul.mubr.bf16.gmra.mxu0 %v558_v55 }
  0x4e   : > { %760 = vmatprep.mubr.bf16.mxu0 %v561_v56  ;;  %v389_v56 = vld [vmem:[#allocation3 + $0x70] sm:$0xff] }
  0x55   : > { %761 = vmatmul.mubr.bf16.gmra.mxu0 %v560_v6 }
  0x56   : > { %768 = vmatprep.mubr.bf16.mxu0 %v563_v57 }
  0x5d   : > { %769 = vmatmul.mubr.bf16.gmra.mxu0 %v562_v58 }
  0x5e   : > { %776 = vmatprep.mubr.bf16.mxu0 %v565_v19 }
  0x65   : > { %777 = vmatmul.mubr.bf16.gmra.mxu0 %v564_v59 }
  0x66   : > { %784 = vmatprep.mubr.bf16.mxu0 %v567_v18 }
  0x6d   : > { %785 = vmatmul.mubr.bf16.gmra.mxu0 %v566_v60 }
  0xa7   : > { %v463_v61 = vpop.xlane.xlu1 %462 }
  0xa8   : > { %v457_v62 = vpop.xlane.xlu0 %456  ;;  %v505_v63 = vadd.f32 %v463_v61, %v377_v28 }
  0xa9   : > { %v503_v0 = vadd.f32 %v457_v62, %v375_v37 }
  0xaa   : > { %522 = vst.msk [vmem:[#allocation3 + $0x10] sm:$0xff] %vm350_vm0, %v505_v63 }
  0xab   : > { %520 = vst.msk [vmem:[#allocation3] sm:$0xff] %vm350_vm0, %v503_v0  ;;  %v466_v3 = vpop.xlane.xlu1 %465 }
  0xac   : > { %v460_v4 = vpop.xlane.xlu0 %459  ;;  %v506_v8 = vadd.f32 %v466_v3, %v378_v1 }
  0xad   : > { %v504_v9 = vadd.f32 %v460_v4, %v376_v2  ;;  %v1030_v2 = vld [vmem:[%s2476_s4] sm:$0xf] }
  0xae   : > { %523 = vst.msk [vmem:[#allocation3 + $0x18] sm:$0xff] %vm350_vm0, %v506_v8  ;;  %1813 = vmatprep.subr.msk.bf16.mxu1 %vm1055_vm2, %v1030_v2  ;;  %v1057_v8 = vsel %vm1055_vm2, %v1030_v2, 0 }
  0xaf   : > { %521 = vst.msk [vmem:[#allocation3 + $0x8] sm:$0xff] %vm350_vm0, %v504_v9  ;;  %v472_v5 = vpop.xlane.xlu1 %471  ;;  %1778 = vmatpush3.bf16.msra.mxu1 %v1057_v8 }
  0xb0   : > { %v469_v12 = vpop.xlane.xlu0 %468  ;;  %v508_v13 = vadd.f32 %v472_v5, %v380_v10 }
  0xb1   : > { %v507_v14 = vadd.f32 %v469_v12, %v379_v11  ;;  %v831_v23 = vld [vmem:[#allocation3 + $0x10] sm:$0xff] }
  0xb2   : > { %v829_v17 = vld [vmem:[#allocation3] sm:$0xff]  ;;  %525 = vst.msk [vmem:[#allocation3 + $0x28] sm:$0xff] %vm350_vm0, %v508_v13  ;;  %v847_v31 = vmax.f32 %v831_v23, 1.0 }
  0xb3   : > { %524 = vst.msk [vmem:[#allocation3 + $0x20] sm:$0xff] %vm350_vm0, %v507_v14  ;;  %v845_v20 = vmax.f32 %v829_v17, 1.0  ;;  %v478_v21 = vpop.xlane.xlu1 %477 }
  0xb4   : > { %v475_v22 = vpop.xlane.xlu0 %474  ;;  %v510_v24 = vadd.f32 %v478_v21, %v382_v15  ;;  %v1029_v21 = vld [vmem:[%s2475_s3] sm:$0xf] }
  0xb5   : > { %v509_v25 = vadd.f32 %v475_v22, %v381_v16  ;;  %1900 = vrcp.f32 %v845_v20  ;;  %v832_v34 = vld [vmem:[#allocation3 + $0x18] sm:$0xff]  ;;  %1814 = vmatprep.subr.msk.bf16.mxu1 %vm1055_vm2, %v1029_v21 }
  0xb6   : > { %v830_v27 = vld [vmem:[#allocation3 + $0x8] sm:$0xff]  ;;  %527 = vst.msk [vmem:[#allocation3 + $0x38] sm:$0xff] %vm350_vm0, %v510_v24  ;;  %v848_v40 = vmax.f32 %v832_v34, 1.0  ;;  %v2321_v24 = vsel %vm1055_vm2, %v1029_v21, 0 }
  0xb7   : > { %526 = vst.msk [vmem:[#allocation3 + $0x30] sm:$0xff] %vm350_vm0, %v509_v25  ;;  %v846_v30 = vmax.f32 %v830_v27, 1.0  ;;  %v484_v32 = vpop.xlane.xlu1 %483 }
  0xb8   : > { %v481_v33 = vpop.xlane.xlu0 %480  ;;  %v512_v35 = vadd.f32 %v484_v32, %v384_v26 }
  0xb9   : > { %1902 = vrcp.f32 %v846_v30  ;;  %v511_v36 = vadd.f32 %v481_v33, %v383_v29  ;;  %v834_v51 = vld [vmem:[#allocation3 + $0x28] sm:$0xff] }
  0xba   : > { %529 = vst.msk [vmem:[#allocation3 + $0x48] sm:$0xff] %vm350_vm0, %v512_v35  ;;  %1904 = vrcp.f32 %v847_v31  ;;  %v833_v43 = vld [vmem:[#allocation3 + $0x20] sm:$0xff]  ;;  %v850_v57 = vmax.f32 %v834_v51, 1.0 }
  0xbb   : > { %528 = vst.msk [vmem:[#allocation3 + $0x40] sm:$0xff] %vm350_vm0, %v511_v36  ;;  %v490_v41 = vpop.xlane.xlu1 %489  ;;  %1906 = vrcp.f32 %v848_v40  ;;  %v849_v48 = vmax.f32 %v833_v43, 1.0  ;;  %v537_v43 = vld [vmem:[#allocation2 + $0x8] sm:$0xff] }
  0xbc   : > { %v487_v42 = vpop.xlane.xlu0 %486  ;;  %v514_v44 = vadd.f32 %v490_v41, %v386_v38  ;;  %v536_v38 = vld [vmem:[#allocation2] sm:$0xff] }
  0xbd   : > { %v513_v45 = vadd.f32 %v487_v42, %v385_v39  ;;  %1908 = vrcp.f32 %v849_v48  ;;  %v836_v0 = vld [vmem:[#allocation3 + $0x38] sm:$0xff]  ;;  %v538_v48 = vld [vmem:[#allocation2 + $0x10] sm:$0xff] }
  0xbe   : > { %531 = vst.msk [vmem:[#allocation3 + $0x58] sm:$0xff] %vm350_vm0, %v514_v44  ;;  %v835_v59 = vld [vmem:[#allocation3 + $0x30] sm:$0xff]  ;;  %v852_v4 = vmax.f32 %v836_v0, 1.0 }
  0xbf   : > { %530 = vst.msk [vmem:[#allocation3 + $0x50] sm:$0xff] %vm350_vm0, %v513_v45  ;;  %v496_v49 = vpop.xlane.xlu1 %495  ;;  %v851_v62 = vmax.f32 %v835_v59, 1.0 }
  0xc0   : > { %v493_v50 = vpop.xlane.xlu0 %492  ;;  %v516_v52 = vadd.f32 %v496_v49, %v388_v46 }
  0xc1   : > { %v515_v7 = vadd.f32 %v493_v50, %v387_v47  ;;  %v838_v55 = vld [vmem:[#allocation3 + $0x48] sm:$0xff] }
  0xc2   : > { %v1901_v53 = vpop.eup %1900  ;;  %533 = vst.msk [vmem:[#allocation3 + $0x68] sm:$0xff] %vm350_vm0, %v516_v52  ;;  %v854_v6 = vmax.f32 %v838_v55, 1.0  ;;  %v837_v10 = vld [vmem:[#allocation3 + $0x40] sm:$0xff] }
  0xc3   : > { %911 = vperm.xlu0 %1874, %v1901_v53   ;;  %532 = vst.msk [vmem:[#allocation3 + $0x60] sm:$0xff] %vm350_vm0, %v515_v7  ;;  %v502_v58 = vpop.xlane.xlu1 %501  ;;  %v853_v12 = vmax.f32 %v837_v10, 1.0  ;;  %v539_v7 = vld [vmem:[#allocation2 + $0x18] sm:$0xff] }
  0xc4   : > { %v499_v19 = vpop.xlane.xlu0 %498  ;;  %v518_v18 = vadd.f32 %v502_v58, %v390_v54  ;;  %1910 = vrcp.f32 %v854_v6  ;;  %v540_v6 = vld [vmem:[#allocation2 + $0x20] sm:$0xff] }
  0xc5   : > { %v517_v60 = vadd.f32 %v499_v19, %v389_v56  ;;  %v840_v37 = vld [vmem:[#allocation3 + $0x58] sm:$0xff]  ;;  %1912 = vrcp.f32 %v850_v57 }
  0xc6   : > { %v1903_v28 = vpop.eup %1902  ;;  %535 = vst.msk [vmem:[#allocation3 + $0x78] sm:$0xff] %vm350_vm0, %v518_v18  ;;  %v856_v61 = vmax.f32 %v840_v37, 1.0  ;;  %v839_v14 = vld [vmem:[#allocation3 + $0x50] sm:$0xff]  ;;  %v541_v18 = vld [vmem:[#allocation2 + $0x28] sm:$0xff] }
  0xc7   : > { %916 = vperm.xlu1 %1875, %v1903_v28   ;;  %534 = vst.msk [vmem:[#allocation3 + $0x70] sm:$0xff] %vm350_vm0, %v517_v60  ;;  %v1905_v63 = vpop.eup %1904  ;;  %v855_v16 = vmax.f32 %v839_v14, 1.0 }
  0xc8   : > { %1914 = vrcp.f32 %v856_v61  ;;  %v1907_v9 = vpop.eup %1906 }
  0xc9   : > { %v842_v1 = vld [vmem:[#allocation3 + $0x68] sm:$0xff]  ;;  %1916 = vrcp.f32 %v851_v62  ;;  %v542_v62 = vld [vmem:[#allocation2 + $0x30] sm:$0xff] }
  0xca   : > { %v858_v3 = vmax.f32 %v842_v1, 1.0  ;;  %v1909_v13 = vpop.eup %1908  ;;  %v841_v20 = vld [vmem:[#allocation3 + $0x60] sm:$0xff] }
  0xcb   : > { %921 = vperm.xlu1 %1875, %v1905_v63   ;;  %v857_v23 = vmax.f32 %v841_v20, 1.0 }
  0xcc   : > { %1918 = vrcp.f32 %v858_v3  ;;  %v543_v3 = vld [vmem:[#allocation2 + $0x38] sm:$0xff] }
  0xcd   : > { %v844_v11 = vld [vmem:[#allocation3 + $0x78] sm:$0xff]  ;;  %1920 = vrcp.f32 %v852_v4 }
  0xce   : > { %v860_v5 = vmax.f32 %v844_v11, 1.0  ;;  %v843_v26 = vld [vmem:[#allocation3 + $0x70] sm:$0xff]  ;;  %v544_v11 = vld [vmem:[#allocation2 + $0x40] sm:$0xff] }
  0xcf   : > { %926 = vperm.xlu1 %1875, %v1907_v9   ;;  %v859_v29 = vmax.f32 %v843_v26, 1.0 }
  0xd0   : > { %1922 = vrcp.f32 %v860_v5 }
  0xd1   : > { %v1911_v15 = vpop.eup %1910  ;;  %1924 = vrcp.f32 %v853_v12 }
  0xd2   : > { %956 = vperm.xlu0 %1874, %v1911_v15   ;;  %v1913_v17 = vpop.eup %1912  ;;  %1926 = vrcp.f32 %v855_v16  ;;  %v545_v15 = vld [vmem:[#allocation2 + $0x48] sm:$0xff] }
  0xd3   : > { %931 = vperm.xlu1 %1875, %v1909_v13   ;;  %1928 = vrcp.f32 %v857_v23 }
  0xd4   : > { %1930 = vrcp.f32 %v859_v29  ;;  %v547_v29 = vld [vmem:[#allocation2 + $0x58] sm:$0xff] }
  0xd5   : > { %v1915_v22 = vpop.eup %1914 }
  0xd6   : > { %966 = vperm.xlu0 %1874, %v1915_v22   ;;  %v1917_v25 = vpop.eup %1916  ;;  %v546_v22 = vld [vmem:[#allocation2 + $0x50] sm:$0xff] }
  0xd7   : > { %936 = vperm.xlu1 %1875, %v1913_v17  }
  0xd9   : > { %v1919_v27 = vpop.eup %1918 }
  0xda   : > { %976 = vperm.xlu0 %1874, %v1919_v27   ;;  %v1921_v30 = vpop.eup %1920 }
  0xdb   : > { %941 = vperm.xlu1 %1875, %v1917_v25  }
  0xdd   : > { %v1923_v31 = vpop.eup %1922 }
  0xde   : > { %986 = vperm.xlu0 %1874, %v1923_v31   ;;  %v1925_v32 = vpop.eup %1924 }
  0xdf   : > { %946 = vperm.xlu1 %1875, %v1921_v30   ;;  %v1927_v33 = vpop.eup %1926 }
  0xe0   : > { %v1929_v34 = vpop.eup %1928 }
  0xe1   : > { %v1931_v35 = vpop.eup %1930 }
  0xe3   : > { %951 = vperm.xlu1 %1875, %v1925_v32  }
  0xe7   : > { %961 = vperm.xlu1 %1875, %v1927_v33  }
  0xeb   : > { %971 = vperm.xlu1 %1875, %v1929_v34   ;;  %v548_v34 = vld [vmem:[#allocation2 + $0x60] sm:$0xff] }
  0xef   : > { %981 = vperm.xlu1 %1875, %v1931_v35  }
  0xf5   : > { %v1711_v36 = vpop.f32.mrf.mxu0 }
  0xf7   : > { %v1712_v39 = vpop.f32.mrf.mxu0 }
  0xf8   : > { %v1713_v40 = vadd.f32 %v1712_v39, %v1711_v36 }
  0xf9   : > { %v1714_v41 = vpop.f32.mrf.mxu0 }
  0xfa   : > { %v793_v42 = vadd.f32 %v1713_v40, %v536_v38  ;;  %v549_v40 = vld [vmem:[#allocation2 + $0x68] sm:$0xff] }
  0xfb   : > { %v1715_v44 = vpop.f32.mrf.mxu0 }
  0xfc   : > { %810 = vst.msk [vmem:[#allocation2] sm:$0xff] %vm333_vm1, %v793_v42  ;;  %v1716_v45 = vadd.f32 %v1715_v44, %v1714_v41 }
  0xfd   : > { %v1717_v46 = vpop.f32.mrf.mxu0 }
  0xfe   : > { %v794_v47 = vadd.f32 %v1716_v45, %v537_v43  ;;  %v550_v45 = vld [vmem:[#allocation2 + $0x70] sm:$0xff] }
  0xff   : > { %v1718_v49 = vpop.f32.mrf.mxu0 }
 0x100   : > { %811 = vst.msk [vmem:[#allocation2 + $0x8] sm:$0xff] %vm333_vm1, %v794_v47  ;;  %v1719_v50 = vadd.f32 %v1718_v49, %v1717_v46 }
 0x101   : > { %v1720_v51 = vpop.f32.mrf.mxu0 }
 0x102   : > { %v795_v52 = vadd.f32 %v1719_v50, %v538_v48  ;;  %v551_v50 = vld [vmem:[#allocation2 + $0x78] sm:$0xff] }
 0x103   : > { %v1721_v53 = vpop.f32.mrf.mxu0 }
 0x104   : > { %812 = vst.msk [vmem:[#allocation2 + $0x10] sm:$0xff] %vm333_vm1, %v795_v52  ;;  %v1722_v54 = vadd.f32 %v1721_v53, %v1720_v51 }
 0x105   : > { %v1723_v55 = vpop.f32.mrf.mxu0 }
 0x106   : > { %v796_v56 = vadd.f32 %v1722_v54, %v539_v7  ;;  %v893_v54 = vld [vmem:[#allocation2] sm:$0xff] }
 0x107   : > { %v1724_v57 = vpop.f32.mrf.mxu0 }
 0x108   : > { %813 = vst.msk [vmem:[#allocation2 + $0x18] sm:$0xff] %vm333_vm1, %v796_v56  ;;  %v1725_v58 = vadd.f32 %v1724_v57, %v1723_v55  ;;  %v894_v55 = vld [vmem:[#allocation2 + $0x8] sm:$0xff] }
 0x109   : > { %v1726_v19 = vpop.f32.mrf.mxu0 }
 0x10a   : > { %v797_v59 = vadd.f32 %v1725_v58, %v540_v6 }
 0x10b   : > { %v1727_v60 = vpop.f32.mrf.mxu0 }
 0x10c   : > { %814 = vst.msk [vmem:[#allocation2 + $0x20] sm:$0xff] %vm333_vm1, %v797_v59  ;;  %v1728_v28 = vadd.f32 %v1727_v60, %v1726_v19  ;;  %v895_v59 = vld [vmem:[#allocation2 + $0x10] sm:$0xff] }
 0x10d   : > { %v1729_v37 = vpop.f32.mrf.mxu0 }
 0x10e   : > { %v798_v61 = vadd.f32 %v1728_v28, %v541_v18 }
 0x10f   : > { %v1730_v63 = vpop.f32.mrf.mxu0  ;;  %v896_v18 = vld [vmem:[#allocation2 + $0x18] sm:$0xff] }
 0x110   : > { %815 = vst.msk [vmem:[#allocation2 + $0x28] sm:$0xff] %vm333_vm1, %v798_v61  ;;  %v1731_v0 = vadd.f32 %v1730_v63, %v1729_v37 }
 0x111   : > { %v1732_v1 = vpop.f32.mrf.mxu0 }
 0x112   : > { %v799_v2 = vadd.f32 %v1731_v0, %v542_v62 }
 0x113   : > { %v1733_v4 = vpop.f32.mrf.mxu0  ;;  %v897_v63 = vld [vmem:[#allocation2 + $0x20] sm:$0xff] }
 0x114   : > { %816 = vst.msk [vmem:[#allocation2 + $0x30] sm:$0xff] %vm333_vm1, %v799_v2  ;;  %v1734_v8 = vadd.f32 %v1733_v4, %v1732_v1 }
 0x115   : > { %v1735_v9 = vpop.f32.mrf.mxu0 }
 0x116   : > { %v800_v10 = vadd.f32 %v1734_v8, %v543_v3 }
 0x117   : > { %v1736_v5 = vpop.f32.mrf.mxu0  ;;  %v898_v0 = vld [vmem:[#allocation2 + $0x28] sm:$0xff] }
 0x118   : > { %817 = vst.msk [vmem:[#allocation2 + $0x38] sm:$0xff] %vm333_vm1, %v800_v10  ;;  %v1737_v12 = vadd.f32 %v1736_v5, %v1735_v9 }
 0x119   : > { %v1738_v13 = vpop.f32.mrf.mxu0 }
 0x11a   : > { %v801_v14 = vadd.f32 %v1737_v12, %v544_v11 }
 0x11b   : > { %v1739_v16 = vpop.f32.mrf.mxu0  ;;  %v899_v10 = vld [vmem:[#allocation2 + $0x30] sm:$0xff] }
 0x11c   : > { %818 = vst.msk [vmem:[#allocation2 + $0x40] sm:$0xff] %vm333_vm1, %v801_v14  ;;  %v1740_v17 = vadd.f32 %v1739_v16, %v1738_v13 }
 0x11d   : > { %v1741_v20 = vpop.f32.mrf.mxu0 }
 0x11e   : > { %v802_v21 = vadd.f32 %v1740_v17, %v545_v15 }
 0x11f   : > { %v1742_v23 = vpop.f32.mrf.mxu0  ;;  %v900_v11 = vld [vmem:[#allocation2 + $0x38] sm:$0xff] }
 0x120   : > { %819 = vst.msk [vmem:[#allocation2 + $0x48] sm:$0xff] %vm333_vm1, %v802_v21  ;;  %v1743_v25 = vadd.f32 %v1742_v23, %v1741_v20 }
 0x121   : > { %v1744_v26 = vpop.f32.mrf.mxu0 }
 0x122   : > { %v803_v27 = vadd.f32 %v1743_v25, %v546_v22 }
 0x123   : > { %v1745_v30 = vpop.f32.mrf.mxu0  ;;  %v901_v17 = vld [vmem:[#allocation2 + $0x40] sm:$0xff] }
 0x124   : > { %820 = vst.msk [vmem:[#allocation2 + $0x50] sm:$0xff] %vm333_vm1, %v803_v27  ;;  %v1746_v31 = vadd.f32 %v1745_v30, %v1744_v26 }
 0x125   : > { %v1747_v32 = vpop.f32.mrf.mxu0 }
 0x126   : > { %v804_v33 = vadd.f32 %v1746_v31, %v547_v29 }
 0x127   : > { %v1748_v35 = vpop.f32.mrf.mxu0  ;;  %v902_v16 = vld [vmem:[#allocation2 + $0x48] sm:$0xff] }
 0x128   : > { %821 = vst.msk [vmem:[#allocation2 + $0x58] sm:$0xff] %vm333_vm1, %v804_v33  ;;  %v1749_v36 = vadd.f32 %v1748_v35, %v1747_v32 }
 0x129   : > { %v1750_v38 = vpop.f32.mrf.mxu0 }
 0x12a   : > { %v805_v39 = vadd.f32 %v1749_v36, %v548_v34 }
 0x12b   : > { %v1751_v41 = vpop.f32.mrf.mxu0  ;;  %v903_v26 = vld [vmem:[#allocation2 + $0x50] sm:$0xff] }
 0x12c   : > { %822 = vst.msk [vmem:[#allocation2 + $0x60] sm:$0xff] %vm333_vm1, %v805_v39  ;;  %v1752_v42 = vadd.f32 %v1751_v41, %v1750_v38 }
 0x12d   : > { %v1753_v43 = vpop.f32.mrf.mxu0 }
 0x12e   : > { %v806_v44 = vadd.f32 %v1752_v42, %v549_v40 }
 0x12f   : > { %v1754_v46 = vpop.f32.mrf.mxu0  ;;  %v904_v22 = vld [vmem:[#allocation2 + $0x58] sm:$0xff] }
 0x130   : > { %823 = vst.msk [vmem:[#allocation2 + $0x68] sm:$0xff] %vm333_vm1, %v806_v44  ;;  %v1755_v47 = vadd.f32 %v1754_v46, %v1753_v43 }
 0x131   : > { %v1756_v48 = vpop.f32.mrf.mxu0 }
 0x132   : > { %v807_v49 = vadd.f32 %v1755_v47, %v550_v45  ;;  %v1892_v45 = vld [vmem:[%s2327_s15] sm:$0xff]   ;;  %v1893_v47 = vld [vmem:[%s2327_s15 + $0x8] sm:$0xff]  }
 0x133   : > { %v1757_v51 = vpop.f32.mrf.mxu0  ;;  %v905_v33 = vld [vmem:[#allocation2 + $0x60] sm:$0xff] }
 0x134   : > { %824 = vst.msk [vmem:[#allocation2 + $0x70] sm:$0xff] %vm333_vm1, %v807_v49  ;;  %v1758_v52 = vadd.f32 %v1757_v51, %v1756_v48  ;;  %v1894_v48 = vld [vmem:[%s2327_s15 + $0x10] sm:$0xff]   ;;  %v1895_v49 = vld [vmem:[%s2327_s15 + $0x18] sm:$0xff]   ;;  %v1897_v51 = vld [vmem:[%s2327_s15 + $0x28] sm:$0xff]  }
 0x136   : > { %v808_v7 = vadd.f32 %v1758_v52, %v551_v50  ;;  %v1896_v50 = vld [vmem:[%s2327_s15 + $0x20] sm:$0xff]   ;;  %v1898_v52 = vld [vmem:[%s2327_s15 + $0x30] sm:$0xff]  }
 0x137   : > { %v906_v31 = vld [vmem:[#allocation2 + $0x68] sm:$0xff] }
 0x138   : > { %825 = vst.msk [vmem:[#allocation2 + $0x78] sm:$0xff] %vm333_vm1, %v808_v7  ;;  %v1899_v7 = vld [vmem:[%s2327_s15 + $0x38] sm:$0xff]   ;;  %s1938_s15 = scalar_lea.vmem %s1937_s14, 2048 }
 0x139   : > { %p1940_p3 = scmp.lt.s32.totalorder %s1938_s15, %s1932_s24 }
 0x13b   : > { %v907_v41 = vld [vmem:[#allocation2 + $0x70] sm:$0xff]  ;;  %p1941_p5 = por %p1940_p3, %p1939_p2 }
 0x13d   : > { %p1942_p6 = pnand %p1941_p5, %p1935_p1 }
 0x13e   : > { %v912_v53 = vpop.permute.xlu0 %911 }
 0x13f   : > { %v989_v6 = vmul.f32 %v912_v53, %v893_v54  ;;  %v908_v38 = vld [vmem:[#allocation2 + $0x78] sm:$0xff] }
 0x142   : > { %v917_v56 = vpop.permute.xlu1 %916 }
 0x143   : > { %v990_v57 = vmul.f32 %v917_v56, %v894_v55 }
 0x145   : > { %v1005_v58 = vpack.c.bf16 %v990_v57, %v989_v6 }
 0x146   : > { %v922_v19 = vpop.permute.xlu1 %921 }
 0x147   : > { %1779 = vmatprep.mubr.msk.bf16.mxu1 %vm333_vm1, %v1005_v58  ;;  %v991_v28 = vmul.f32 %v922_v19, %v895_v59 }
 0x14a   : > { %v927_v60 = vpop.permute.xlu1 %926 }
 0x14b   : > { %v992_v37 = vmul.f32 %v927_v60, %v896_v18 }
 0x14d   : > { %v1006_v61 = vpack.c.bf16 %v992_v37, %v991_v28  ;;  %v957_v8 = vpop.permute.xlu0 %956 }
 0x14e   : > { %v932_v62 = vpop.permute.xlu1 %931  ;;  %v998_v20 = vmul.f32 %v957_v8, %v902_v16 }
 0x14f   : > { %1780 = vmatmul.mubr.msk.bf16.vlgmr.msra.gmra.mxu1 %vm333_vm1, %v1006_v61  ;;  %v993_v2 = vmul.f32 %v932_v62, %v897_v63 }
 0x150   : > { %1796 = vmatpush3.bf16.msra.mxu1 %v2321_v24 }
 0x151   : > { %v967_v14 = vpop.permute.xlu0 %966 }
 0x152   : > { %v937_v1 = vpop.permute.xlu1 %936  ;;  %v1000_v29 = vmul.f32 %v967_v14, %v904_v22 }
 0x153   : > { %v994_v3 = vmul.f32 %v937_v1, %v898_v0 }
 0x155   : > { %v1007_v4 = vpack.c.bf16 %v994_v3, %v993_v2  ;;  %v977_v25 = vpop.permute.xlu0 %976  ;;  %v2381_v2 = vld [vmem:[%s2477_s5] ss:$0 sm:$0xff] }
 0x156   : > { %v942_v9 = vpop.permute.xlu1 %941  ;;  %v1002_v35 = vmul.f32 %v977_v25, %v906_v31 }
 0x157   : > { %1783 = vmatprep.mubr.msk.bf16.mxu1 %vm333_vm1, %v1007_v4  ;;  %v995_v12 = vmul.f32 %v942_v9, %v899_v10 }
 0x159   : > { %v987_v39 = vpop.permute.xlu0 %986 }
 0x15a   : > { %v947_v5 = vpop.permute.xlu1 %946  ;;  %v1004_v43 = vmul.f32 %v987_v39, %v908_v38 }
 0x15b   : > { %v996_v13 = vmul.f32 %v947_v5, %v900_v11 }
 0x15d   : > { %v1008_v15 = vpack.c.bf16 %v996_v13, %v995_v12 }
 0x15e   : > { %v952_v24 = vpop.permute.xlu1 %951 }
 0x15f   : > { %v997_v21 = vmul.f32 %v952_v24, %v901_v17  ;;  %1784 = vmatmul.mubr.msk.bf16.gmra.mxu1 %vm333_vm1, %v1008_v15 }
 0x161   : > { %v1009_v23 = vpack.c.bf16 %v998_v20, %v997_v21 }
 0x162   : > { %v962_v27 = vpop.permute.xlu1 %961 }
 0x163   : > { %v999_v30 = vmul.f32 %v962_v27, %v903_v26  ;;  %1787 = vmatprep.mubr.msk.bf16.mxu1 %vm333_vm1, %v1009_v23 }
 0x165   : > { %v1010_v32 = vpack.c.bf16 %v1000_v29, %v999_v30 }
 0x166   : > { %v972_v34 = vpop.permute.xlu1 %971 }
 0x167   : > { %v1001_v36 = vmul.f32 %v972_v34, %v905_v33  ;;  %1788 = vmatmul.mubr.msk.bf16.gmra.mxu1 %vm333_vm1, %v1010_v32 }
 0x169   : > { %v1011_v40 = vpack.c.bf16 %v1002_v35, %v1001_v36 }
 0x16a   : > { %v982_v42 = vpop.permute.xlu1 %981 }
 0x16b   : > { %v1003_v44 = vmul.f32 %v982_v42, %v907_v41  ;;  %1791 = vmatprep.mubr.msk.bf16.mxu1 %vm333_vm1, %v1011_v40 }
 0x16d   : > { %v1012_v46 = vpack.c.bf16 %v1004_v43, %v1003_v44 }
 0x16f   : > { %1792 = vmatmul.mubr.msk.bf16.gmra.mxu1 %vm333_vm1, %v1012_v46 }
 0x170   : > { %1797 = vmatprep.mubr.msk.bf16.mxu1 %vm333_vm1, %v1892_v45 }
 0x177   : > { %1798 = vmatmul.mubr.msk.bf16.vlgmr.msra.gmra.mxu1 %vm333_vm1, %v1893_v47 }
 0x178   : > { %1801 = vmatprep.mubr.msk.bf16.mxu1 %vm333_vm1, %v1894_v48 }
 0x17f   : > { %1802 = vmatmul.mubr.msk.bf16.gmra.mxu1 %vm333_vm1, %v1895_v49 }
 0x180   : > { %1805 = vmatprep.mubr.msk.bf16.mxu1 %vm333_vm1, %v1896_v50 }
 0x187   : > { %1806 = vmatmul.mubr.msk.bf16.gmra.mxu1 %vm333_vm1, %v1897_v51 }
 0x188   : > { %1809 = vmatprep.mubr.msk.bf16.mxu1 %vm333_vm1, %v1898_v52 }
 0x18f   : > { %1810 = vmatmul.mubr.msk.bf16.gmra.mxu1 %vm333_vm1, %v1899_v7 }
 0x20f   : > { %v1781_v53 = vpop.f32.mrf.mxu1 }
 0x211   : > { %v1093_v54 = vpop.f32.mrf.mxu1 }
 0x213   : > { %v1782_v55 = vpop.f32.mrf.mxu1 }
 0x215   : > { %v1096_v56 = vpop.f32.mrf.mxu1 }
 0x21f   : > { %v1785_v6 = vpop.f32.mrf.mxu1 }
 0x221   : > { %v1109_v57 = vpop.f32.mrf.mxu1 }
 0x223   : > { %v1786_v58 = vpop.f32.mrf.mxu1 }
 0x225   : > { %v1112_v19 = vpop.f32.mrf.mxu1 }
 0x227   : > { %v1789_v59 = vpop.f32.mrf.mxu1 }
 0x229   : > { %v1125_v18 = vpop.f32.mrf.mxu1 }
 0x22b   : > { %v1790_v60 = vpop.f32.mrf.mxu1 }
 0x22d   : > { %v1128_v28 = vpop.f32.mrf.mxu1 }
 0x22f   : > { %v2370_v37 = vpop.f32.mrf.mxu1 }
 0x231   : > { %v2372_v61 = vpop.f32.mrf.mxu1 }
 0x233   : > { %v2374_v62 = vpop.f32.mrf.mxu1 }
 0x235   : > { %v2376_v63 = vpop.f32.mrf.mxu1 }
 0x237   : > { %v1799_v0 = vpop.f32.mrf.mxu1 }
 0x238   : > { %v1266_v1 = vadd.f32 %v1799_v0, %v1781_v53 }
 0x239   : > { %v1257_v3 = vpop.f32.mrf.mxu1 }
 0x23a   : > { %v1258_v4 = vadd.f32 %v1257_v3, %v1093_v54  ;;  %v1329_v9 = vadd.f32 %v2381_v2, %v1266_v1 }
 0x23b   : > { %v1800_v8 = vpop.f32.mrf.mxu1 }
 0x23c   : > { %v1269_v10 = vadd.f32 %v1800_v8, %v1782_v55  ;;  %v1327_v5 = vadd.f32 %v2381_v2, %v1258_v4  ;;  %v1345_v15 = vmax.f32 %v1329_v9, 0.0 }
 0x23d   : > { %v1260_v11 = vpop.f32.mrf.mxu1 }
 0x23e   : > { %v1330_v12 = vadd.f32 %v2381_v2, %v1269_v10  ;;  %v1261_v13 = vadd.f32 %v1260_v11, %v1096_v56  ;;  %v1343_v21 = vmax.f32 %v1327_v5, 0.0 }
 0x23f   : > { %v1803_v14 = vpop.f32.mrf.mxu1 }
 0x240   : > { %v1346_v16 = vmax.f32 %v1330_v12, 0.0  ;;  %v1328_v17 = vadd.f32 %v2381_v2, %v1261_v13  ;;  %v1282_v24 = vadd.f32 %v1803_v14, %v1785_v6 }
 0x241   : > { %v1273_v20 = vpop.f32.mrf.mxu1 }
 0x242   : > { %v1656_v22 = vpack.c.bf16 %v1346_v16, %v1345_v15  ;;  %v1344_v23 = vmax.f32 %v1328_v17, 0.0  ;;  %v1274_v25 = vadd.f32 %v1273_v20, %v1109_v57  ;;  %v1333_v29 = vadd.f32 %v2381_v2, %v1282_v24 }
 0x243   : > { %v1804_v26 = vpop.f32.mrf.mxu1 }
 0x244   : > { %1688 = vst [vmem:[%s2390_s19 + $0x8] sm:$0xff] %v1656_v22   ;;  %v1651_v27 = vpack.c.bf16 %v1344_v23, %v1343_v21  ;;  %v1285_v30 = vadd.f32 %v1804_v26, %v1786_v58  ;;  %v1331_v32 = vadd.f32 %v2381_v2, %v1274_v25  ;;  %v1349_v36 = vmax.f32 %v1333_v29, 0.0 }
 0x245   : > { %v1276_v31 = vpop.f32.mrf.mxu1 }
 0x246   : > { %1652 = vst [vmem:[%s2390_s19] sm:$0xff] %v1651_v27   ;;  %v1334_v33 = vadd.f32 %v2381_v2, %v1285_v30  ;;  %v1277_v34 = vadd.f32 %v1276_v31, %v1112_v19  ;;  %v1347_v42 = vmax.f32 %v1331_v32, 0.0 }
 0x247   : > { %v1807_v35 = vpop.f32.mrf.mxu1 }
 0x248   : > { %v1350_v38 = vmax.f32 %v1334_v33, 0.0  ;;  %v1332_v39 = vadd.f32 %v2381_v2, %v1277_v34  ;;  %v1298_v40 = vadd.f32 %v1807_v35, %v1789_v59 }
 0x249   : > { %v1289_v41 = vpop.f32.mrf.mxu1 }
 0x24a   : > { %v1666_v43 = vpack.c.bf16 %v1350_v38, %v1349_v36  ;;  %v1348_v44 = vmax.f32 %v1332_v39, 0.0  ;;  %v1290_v45 = vadd.f32 %v1289_v41, %v1125_v18  ;;  %v1337_v48 = vadd.f32 %v2381_v2, %v1298_v40 }
 0x24b   : > { %v1808_v46 = vpop.f32.mrf.mxu1 }
 0x24c   : > { %1690 = vst [vmem:[%s2390_s19 + $0x18] sm:$0xff] %v1666_v43   ;;  %v1661_v47 = vpack.c.bf16 %v1348_v44, %v1347_v42  ;;  %v1301_v49 = vadd.f32 %v1808_v46, %v1790_v60  ;;  %v1335_v51 = vadd.f32 %v2381_v2, %v1290_v45  ;;  %v1353_v54 = vmax.f32 %v1337_v48, 0.0 }
 0x24d   : > { %v1292_v50 = vpop.f32.mrf.mxu1 }
 0x24e   : > { %1689 = vst [vmem:[%s2390_s19 + $0x10] sm:$0xff] %v1661_v47   ;;  %v1338_v52 = vadd.f32 %v2381_v2, %v1301_v49  ;;  %v1293_v7 = vadd.f32 %v1292_v50, %v1128_v28  ;;  %v1351_v58 = vmax.f32 %v1335_v51, 0.0 }
 0x24f   : > { %v1811_v53 = vpop.f32.mrf.mxu1 }
 0x250   : > { %v1354_v55 = vmax.f32 %v1338_v52, 0.0  ;;  %v1336_v56 = vadd.f32 %v2381_v2, %v1293_v7  ;;  %v1314_v6 = vadd.f32 %v1811_v53, %v2370_v37 }
 0x251   : > { %v1305_v57 = vpop.f32.mrf.mxu1 }
 0x252   : > { %v1676_v19 = vpack.c.bf16 %v1354_v55, %v1353_v54  ;;  %v1352_v59 = vmax.f32 %v1336_v56, 0.0  ;;  %v1306_v18 = vadd.f32 %v1305_v57, %v2372_v61  ;;  %v1341_v28 = vadd.f32 %v2381_v2, %v1314_v6 }
 0x253   : > { %v1812_v60 = vpop.f32.mrf.mxu1 }
 0x254   : > { %1692 = vst [vmem:[%s2390_s19 + $0x28] sm:$0xff] %v1676_v19   ;;  %v1671_v0 = vpack.c.bf16 %v1352_v59, %v1351_v58  ;;  %v1317_v1 = vadd.f32 %v1812_v60, %v2374_v62  ;;  %v1339_v37 = vadd.f32 %v2381_v2, %v1306_v18  ;;  %v1357_v9 = vmax.f32 %v1341_v28, 0.0 }
 0x255   : > { %v1308_v3 = vpop.f32.mrf.mxu1 }
 0x256   : > { %1691 = vst [vmem:[%s2390_s19 + $0x20] sm:$0xff] %v1671_v0   ;;  %v1342_v4 = vadd.f32 %v2381_v2, %v1317_v1  ;;  %v1309_v8 = vadd.f32 %v1308_v3, %v2376_v63  ;;  %v1355_v11 = vmax.f32 %v1339_v37, 0.0 }
 0x258   : > { %v1358_v61 = vmax.f32 %v1342_v4, 0.0  ;;  %v1340_v10 = vadd.f32 %v2381_v2, %v1309_v8 }
 0x25a   : > { %v1686_v62 = vpack.c.bf16 %v1358_v61, %v1357_v9  ;;  %v1356_v5 = vmax.f32 %v1340_v10, 0.0 }
 0x25c   : > { %1694 = vst [vmem:[%s2390_s19 + $0x38] sm:$0xff] %v1686_v62   ;;  %v1681_v63 = vpack.c.bf16 %v1356_v5, %v1355_v11 }
 0x25e   : > { %1693 = vst [vmem:[%s2390_s19 + $0x30] sm:$0xff] %v1681_v63  }
 0x25f   : > { %1945 = shalt.err (!%p1942_p6)
}
 0x260   : > { %s1946_s16 = scalar_lea.hbm %s2419_s8, 1024  ;;  %s1950_s18 = scalar_lea.hbm %s2478_s6, 2048 }
 0x261   : > { %p1947_p7 = scmp.ne.s32.totalorder %s2419_s8, %s1946_s16  ;;  %p1951_p11 = scmp.lt.s32.totalorder %s2419_s8, %s2478_s6 }
 0x262   : > { %p1952_p12 = scmp.lt.s32.totalorder %s1950_s18, %s1946_s16 }
 0x263   : > { %p1948_p9 = pnand %p1947_p7, %p2090_p4 }
 0x264   : > { %p1953_p13 = por %p1952_p12, %p1951_p11 }
 0x265   : > { %p1949_p10 = pneg %p1948_p9 }
 0x267   : > { %p1954_p0 = pnand %p1953_p13, %p1949_p10 }
 0x269   : > { %1957 = shalt.err (!%p1954_p0)
}
 0x26a   : > { %s2013_s28 = smov 64   ;;  %s2014_s30 = smov 4  }
 0x26b   : > { %1815 = dma.vmem_to_hbm [thread:$0]  (%p2090_p4), %s2421_s27, 1024, %s2419_s8, %s2427_s12, %s2013_s28, %s2013_s28, %s2014_s30  }
 0x26c PF: > { %p1821_p1 = scmp.ge.s32.totalorder %s2008_s26, 2  ;;  %s1468_s24 = sand.u32 1, %s1988_s21  }
 0x26d   : > { %s1469_s13 = scalar_lea.sflag [#allocation5], %s1468_s24 }
 0x26e   : > { %p1818_p2 = pnand %p1821_p1, %p2097_p8 }
 0x270   : > { %p1819_p3 = pneg %p1818_p2 }
 0x272   : > { %1983 = dma.done.wait (%p1819_p3), %s1469_s13, 1024  }
 0x273   : > { %1985 = vsyncadd (%p1819_p3), %s1469_s13, 4294966272  ;;  %s19_s26 = sadd.s32 1, %s2008_s26   ;;  %s2481_s21 = smov %s1992_s22 }
 0x274   : > { %p16_p5 = scmp.ge.s32.totalorder %s19_s26, 4   ;;  %s2482_s22 = smov %s1996_s23 }
 0x275   : > { %s2483_s23 = smov %s2103_s10  ;;  %s2484_s24 = smov %s2004_s25 }
 0x276   : > { %s2485_s25 = smov %s2487_s29  ;;  %18 = sbr.rel (!%p16_p5) target bundleno = 4 (0x4), region = 93 }
 0x27b   :  { %1474 = vsyncpa [#allocation5], 1 }
 0x27c   :  { %1476 = vsyncpa [#allocation5 + $0x1], 1 }

</bundles_post_ra>
